<compile_context>
chip_gen: v6e
topology: v6e:2x2x1
jax: 0.10.0
libtpu: 0.0.40
codegen_flags: <defaults>
</compile_context>

<pallas_src>
import jax
import jax.numpy as jnp
from jax.experimental import pallas as pl
from jax.experimental.pallas import tpu as pltpu  # noqa: F401  (kept for the scaling template)


def linear_kernel(x_ref, w_ref, b_ref, o_ref):
    # y = x @ W + b with tiny K (=3): unrolled VPU FMAs, no MXU involvement.
    x = x_ref[...]                                   # (B, K) f32
    w = w_ref[...]                                   # (K, N) f32
    acc = jnp.broadcast_to(b_ref[...], o_ref.shape).astype(jnp.float32)
    for k in range(x.shape[1]):                      # K is static -> unrolled at trace time
        acc = acc + x[:, k:k + 1] * w[k:k + 1, :]    # (B,1)*(1,N) broadcast FMA on the VPU
    o_ref[...] = acc


@jax.jit
def my_linear(x, w_t, b_2d):
    """Equivalent of MyLinear.forward: y = x @ w_t + b.

    `w_t` is the pre-transposed (K, N) weight, `b_2d` is the (1, N) bias —
    both prepared once outside the per-call path.
    """
    B, K = x.shape
    N = w_t.shape[1]
    return pl.pallas_call(
        linear_kernel,
        out_shape=jax.ShapeDtypeStruct((B, N), jnp.float32),
        in_specs=[
            pl.BlockSpec((B, K), lambda: (0, 0)),   # full-array blocks: Mosaic masks
            pl.BlockSpec((K, N), lambda: (0, 0)),   # the sub-(8,128) loads internally.
            pl.BlockSpec((1, N), lambda: (0, 0)),
        ],
        out_specs=pl.BlockSpec((B, N), lambda: (0, 0)),
    )(x, w_t, b_2d)


if __name__ == "__main__":
    input_dim, output_dim = 3, 2
    batch = 8

    key = jax.random.PRNGKey(0)
    k_x, k_w, k_b = jax.random.split(key, 3)

    # PyTorch-style parameters: weight (output_dim, input_dim), bias (output_dim,)
    bound = 1.0 / (input_dim ** 0.5)  # same scale as nn.Linear's default init
    weight = jax.random.uniform(
        k_w, (output_dim, input_dim), jnp.float32, minval=-bound, maxval=bound
    )
    bias = jax.random.uniform(
        k_b, (output_dim,), jnp.float32, minval=-bound, maxval=bound
    )
    x = jax.random.normal(k_x, (batch, input_dim), jnp.float32)

    # Hoisted, once-per-model conversions (NOT per forward call):
    w_t = jnp.asarray(weight.T, jnp.float32)                  # (K, N)
    b_2d = jnp.asarray(bias, jnp.float32).reshape(1, output_dim)

    y = my_linear(x, w_t, b_2d)
    jax.block_until_ready(y)

    # Cross-check against plain-JAX reference of the PyTorch module.
    y_ref = x @ weight.T + bias
    assert y.shape == (batch, output_dim)
    assert jnp.allclose(y, y_ref, atol=1e-5, rtol=1e-5)

    print("KERNEL_OK")
</pallas_src>

<mosaic_0001>
module attributes {stable_mosaic.version = 11 : i64} {
  func.func @linear_kernel(%arg0: memref<8x3xf32, #tpu.memory_space<vmem>>, %arg1: memref<3x2xf32, #tpu.memory_space<vmem>>, %arg2: memref<1x2xf32, #tpu.memory_space<vmem>>, %arg3: memref<8x2xf32, #tpu.memory_space<vmem>>) attributes {dimension_semantics = [], scalar_prefetch = 0 : i64, scratch_operands = 0 : i64, tpu.core_type = #tpu.core_type<tc>} {
    %c0 = arith.constant 0 : index
    %c0_0 = arith.constant 0 : index
    %0 = vector.load %arg0[%c0, %c0_0] : memref<8x3xf32, #tpu.memory_space<vmem>>, vector<8x3xf32>
    %c0_1 = arith.constant 0 : index
    %c0_2 = arith.constant 0 : index
    %1 = vector.load %arg1[%c0_1, %c0_2] : memref<3x2xf32, #tpu.memory_space<vmem>>, vector<3x2xf32>
    %c0_3 = arith.constant 0 : index
    %c0_4 = arith.constant 0 : index
    %2 = vector.load %arg2[%c0_3, %c0_4] : memref<1x2xf32, #tpu.memory_space<vmem>>, vector<1x2xf32>
    %3 = vector.shape_cast %2 : vector<1x2xf32> to vector<1x2xf32>
    %4 = vector.broadcast %3 : vector<1x2xf32> to vector<8x2xf32>
    %5 = vector.extract_strided_slice %0 {offsets = [0, 0], sizes = [8, 1], strides = [1, 1]} : vector<8x3xf32> to vector<8x1xf32>
    %6 = vector.extract_strided_slice %1 {offsets = [0, 0], sizes = [1, 2], strides = [1, 1]} : vector<3x2xf32> to vector<1x2xf32>
    %7 = vector.broadcast %5 : vector<8x1xf32> to vector<8x2xf32>
    %8 = vector.broadcast %6 : vector<1x2xf32> to vector<8x2xf32>
    %9 = arith.mulf %7, %8 : vector<8x2xf32>
    %10 = arith.addf %4, %9 : vector<8x2xf32>
    %11 = vector.extract_strided_slice %0 {offsets = [0, 1], sizes = [8, 1], strides = [1, 1]} : vector<8x3xf32> to vector<8x1xf32>
    %12 = vector.extract_strided_slice %1 {offsets = [1, 0], sizes = [1, 2], strides = [1, 1]} : vector<3x2xf32> to vector<1x2xf32>
    %13 = vector.broadcast %11 : vector<8x1xf32> to vector<8x2xf32>
    %14 = vector.broadcast %12 : vector<1x2xf32> to vector<8x2xf32>
    %15 = arith.mulf %13, %14 : vector<8x2xf32>
    %16 = arith.addf %10, %15 : vector<8x2xf32>
    %17 = vector.extract_strided_slice %0 {offsets = [0, 2], sizes = [8, 1], strides = [1, 1]} : vector<8x3xf32> to vector<8x1xf32>
    %18 = vector.extract_strided_slice %1 {offsets = [2, 0], sizes = [1, 2], strides = [1, 1]} : vector<3x2xf32> to vector<1x2xf32>
    %19 = vector.broadcast %17 : vector<8x1xf32> to vector<8x2xf32>
    %20 = vector.broadcast %18 : vector<1x2xf32> to vector<8x2xf32>
    %21 = arith.mulf %19, %20 : vector<8x2xf32>
    %22 = arith.addf %16, %21 : vector<8x2xf32>
    %c0_5 = arith.constant 0 : index
    %c0_6 = arith.constant 0 : index
    %23 = vector.load %arg3[%c0_5, %c0_6] : memref<8x2xf32, #tpu.memory_space<vmem>>, vector<8x2xf32>
    tpu.vector_store %arg3[%c0_5, %c0_6], %22 {strides = array<i32>} : memref<8x2xf32, #tpu.memory_space<vmem>>, vector<8x2xf32>,
    return
  }
}

</mosaic_0001>

<bundles_post_ra>
// kernel: my_linear.1
= control target key start
LH: loop header
LB: loop body
LE: loop exit
PB: predicated region body
PF: predicated region fallthrough
CT: control target
= control target key end

     0   :  { %v68_v0 = vmov 0   ;;  %v69_v2 = vmov 2   ;;  %v70_v3 = vmov 1   ;;  %v28_v4 = vlaneseq  ;;  %s103_s0 = inlined_call_operand.vmem [shape: f32[8,3], index: 0, kind: input, shape index: {}]   ;;  %s104_s1 = inlined_call_operand.vmem [shape: f32[3,2], index: 1, kind: input, shape index: {}]   ;;  %s105_s2 = inlined_call_operand.vmem [shape: f32[1,2], index: 2, kind: input, shape index: {}]   ;;  %s106_s3 = inlined_call_operand.vmem [shape: f32[8,2], index: 3, kind: output, shape index: {}]  }
   0x1   :  { %64 = vset.pattern.permute.xlu0 %v68_v0  ;;  %v14_v1 = vld [vmem:[%s103_s0] sm:$0xff]  ;;  %66 = vset.pattern.permute.xlu1 %v69_v2  ;;  %vm54_vm0 = vcmask 15360  }
   0x2   :  { %25 = vperm.xlu0 %64, %v14_v1   ;;  %45 = vperm.xlu1 %66, %v14_v1   ;;  %v29_v5 = vshrl.u32 %v28_v4, 7  ;;  %v15_v7 = vld [vmem:[%s104_s1] sm:$0x7] }
   0x3   :  { %v60_v15 = vld [vmem:[%s105_s2] ss:$0 sm:$0xff] }
   0x4   :  { %v30_v6 = vsub.s32 0, %v29_v5  ;;  %v40_v9 = vsub.s32 1, %v29_v5  ;;  %v50_v10 = vsub.s32 2, %v29_v5 }
   0x6   :  { %65 = vset.pattern.permute.xlu0 %v70_v3  ;;  %v31_v8 = vrot.slane %v15_v7, %v30_v6  ;;  %v41_v13 = vrot.slane %v15_v7, %v40_v9  ;;  %v51_v14 = vrot.slane %v15_v7, %v50_v10 }
   0x7   :  { %35 = vperm.xlu0 %65, %v14_v1  }
   0xb   :  { %67 = vset.pattern.permute.xlu0 %v69_v2 }
  0x7d   :  { %v26_v11 = vpop.permute.xlu0 %25  ;;  %v46_v16 = vpop.permute.xlu1 %45 }
  0x7e   :  { %v32_v12 = vmul.f32 %v31_v8, %v26_v11  ;;  %v52_v20 = vmul.f32 %v51_v14, %v46_v16 }
  0x80   :  { %v33_v18 = vadd.f32 %v60_v15, %v32_v12 }
  0x82   :  { %v36_v17 = vpop.permute.xlu0 %35 }
  0x83   :  { %v42_v19 = vmul.f32 %v41_v13, %v36_v17 }
  0x85   :  { %v43_v21 = vadd.f32 %v42_v19, %v33_v18 }
  0x87   :  { %v53_v22 = vadd.f32 %v52_v20, %v43_v21 }
  0x89   :  { %55 = vst.msk [vmem:[%s106_s3] sm:$0xff] %vm54_vm0, %v53_v22 }

</bundles_post_ra>
